<compile_context>
chip_gen: v5e
topology: v5e:2x2
jax: 0.10.0
libtpu: 0.0.40
codegen_flags: <defaults>
</compile_context>

<pallas_src>
import jax
import jax.numpy as jnp
from jax.experimental import pallas as pl
from jax.experimental.pallas import tpu as pltpu

ALPHA = 1.0           # module default
GAMMA = 2.0           # module default (== 2 -> explicit square in the kernel)
LANES = 128
SUBLANES = 8
CHUNK = SUBLANES * LANES      # 1024-element granularity of the kernel region
MAX_ROW_TILE = 4096           # 4096 x 128 f32 = 2 MiB per input block


def _cdiv(a, b):
    return (a + b - 1) // b


def _focal_math_torch(x, t):
    """Exact PyTorch-forward math (sigmoid + clamped-log BCE). Used for the
    pure-JAX ragged tail and as the reference."""
    x = x.astype(jnp.float32)
    t = t.astype(jnp.float32)
    p = jax.nn.sigmoid(x)
    ce = -(t * jnp.maximum(jnp.log(p), -100.0)
           + (1.0 - t) * jnp.maximum(jnp.log(1.0 - p), -100.0))
    p_t = p * t + (1.0 - p) * (1.0 - t)
    loss = ce * (1.0 - p_t) ** GAMMA
    if ALPHA >= 0:
        alpha_t = ALPHA * t + (1.0 - ALPHA) * (1.0 - t)
        loss = alpha_t * loss
    return jnp.sum(loss)


def _make_focal_kernel(row_tile, rows_total, needs_mask):
    """Kernel over one (row_tile, 128) block; accumulates into an (8,128) block."""

    def kernel(x_ref, t_ref, out_ref):
        i = pl.program_id(0)

        @pl.when(i == 0)
        def _init():
            out_ref[...] = jnp.zeros_like(out_ref)

        x = x_ref[...]
        t = t_ref[...]
        if x.dtype != jnp.float32:
            x = x.astype(jnp.float32)
        if t.dtype != jnp.float32:
            t = t.astype(jnp.float32)

        # Hard {0,1} target rewrite:  z = (2t-1)*x  =>  p_t = sigmoid(z),
        # ce = -clamp(log p_t, -100).  2 EUP ops/elem instead of 3.
        z = (2.0 * t - 1.0) * x
        p_t = jax.nn.sigmoid(z)
        ce = -jnp.maximum(jnp.log(p_t), -100.0)
        w = 1.0 - p_t
        loss = ce * (w * w)                      # gamma == 2 -> explicit square
        if ALPHA == 1.0:                         # folded at trace time
            loss = t * loss
        elif ALPHA >= 0:
            loss = (ALPHA * t + (1.0 - ALPHA) * (1.0 - t)) * loss

        if needs_mask:
            # Only the last grid step's block extends past the array; the mask
            # is a handful of VPU ops per vreg (VPU has slack).
            row_ids = i * row_tile + jax.lax.broadcasted_iota(
                jnp.int32, (row_tile, LANES), 0)
            loss = jnp.where(row_ids < rows_total, loss, 0.0)

        # vreg-shaped partial sum: (row_tile,128) -> (row_tile//8, 8, 128),
        # reduced over the leading axis with pure VPU adds (no XLU).
        partial = jnp.sum(loss.reshape(row_tile // SUBLANES, SUBLANES, LANES), axis=0)
        out_ref[...] += partial

    return kernel


@jax.jit
def _focal_loss_impl(x_flat, t_flat):
    n = x_flat.shape[0]
    rem = n % CHUNK
    n_main = n - rem

    total = jnp.zeros((), jnp.float32)

    if rem:
        # <1024-element ragged tail in plain JAX.
        # TODO(synk): when rem != 0 the prefix slice below may cost one extra
        # HBM pass; typical segmentation shapes (H*W multiple of 1024) take the
        # zero-copy path (rem == 0, no slice, pure reshape).
        total = total + _focal_math_torch(x_flat[n_main:], t_flat[n_main:])

    if n_main:
        rows = n_main // LANES                      # multiple of 8 by construction
        x_main = x_flat if rem == 0 else x_flat[:n_main]
        t_main = t_flat if rem == 0 else t_flat[:n_main]
        x2 = x_main.reshape(rows, LANES)            # zero-copy reshape when rem == 0
        t2 = t_main.reshape(rows, LANES)

        row_tile = min(MAX_ROW_TILE, rows)          # always a multiple of 8
        num_blocks = _cdiv(rows, row_tile)
        needs_mask = (rows % row_tile) != 0

        kernel = _make_focal_kernel(row_tile, rows, needs_mask)

        bytes_accessed = (n_main * (x2.dtype.itemsize + t2.dtype.itemsize)
                          + SUBLANES * LANES * 4)

        partial = pl.pallas_call(
            kernel,
            out_shape=jax.ShapeDtypeStruct((SUBLANES, LANES), jnp.float32),
            grid_spec=pltpu.PrefetchScalarGridSpec(
                num_scalar_prefetch=0,
                grid=(num_blocks,),
                in_specs=[
                    pl.BlockSpec((row_tile, LANES), lambda i: (i, 0)),
                    pl.BlockSpec((row_tile, LANES), lambda i: (i, 0)),
                ],
                # Resident (8,128) accumulator across the reduction axis.
                out_specs=pl.BlockSpec((SUBLANES, LANES), lambda i: (0, 0)),
            ),
            compiler_params=pltpu.CompilerParams(
                dimension_semantics=("arbitrary",),
                vmem_limit_bytes=32 * 1024 * 1024,
            ),
            cost_estimate=pl.CostEstimate(
                flops=20 * n_main,
                transcendentals=2 * n_main,
                bytes_accessed=int(bytes_accessed),
            ),
        )(x2, t2)

        # Final cross-lane/sublane reduce done once, outside the kernel.
        total = total + jnp.sum(partial)

    return total


def focal_loss(inputs, targets):
    """inputs = (logits, confidence); reduction='sum'. Returns scalar f32.
    Inputs are streamed in their native dtype (bf16/int8 targets are upcast
    in-kernel, saving HBM bytes)."""
    logits, _confidence = inputs      # confidence is unused by the forward pass
    return _focal_loss_impl(logits.reshape(-1), targets.reshape(-1))


def focal_loss_ref(inputs, targets):
    """Pure-JAX reference mirroring the PyTorch forward exactly."""
    logits, _ = inputs
    return _focal_math_torch(logits.reshape(-1), targets.reshape(-1))


if __name__ == "__main__":
    key = jax.random.PRNGKey(0)
    k1, k2, k3 = jax.random.split(key, 3)

    # NCHW: batch=2, channels=1 (binary segmentation logit map), spatial 32x32
    shape = (2, 1, 32, 32)
    logits = jax.random.normal(k1, shape, dtype=jnp.float32)
    targets = (jax.random.uniform(k2, shape) > 0.5).astype(jnp.float32)
    confidence = jax.random.normal(k3, (2, 1), dtype=jnp.float32)  # ignored

    out = focal_loss((logits, confidence), targets)
    out = jax.block_until_ready(out)

    ref = focal_loss_ref((logits, confidence), targets)
    assert jnp.allclose(out, ref, rtol=1e-4, atol=1e-3), (out, ref)

    print("KERNEL_OK")
</pallas_src>

<mosaic_0001>
module attributes {stable_mosaic.version = 11 : i64} {
  func.func @kernel(%arg0: i32, %arg1: memref<16x128xf32, #tpu.memory_space<vmem>>, %arg2: memref<16x128xf32, #tpu.memory_space<vmem>>, %arg3: memref<8x128xf32, #tpu.memory_space<vmem>>) attributes {dimension_semantics = [#tpu.dimension_semantics<arbitrary>], iteration_bounds = array<i64: 1>, scalar_prefetch = 0 : i64, scratch_operands = 0 : i64, tpu.core_type = #tpu.core_type<tc>, window_params = [{transform_indices = @transform_0, window_bounds = array<i64: 16, 128>}, {transform_indices = @transform_1, window_bounds = array<i64: 16, 128>}, {pipeline_mode = #tpu.pipeline_mode<synchronous>, transform_indices = @transform_2, window_bounds = array<i64: 8, 128>}]} {
    %c0_i32 = arith.constant 0 : i32
    %0 = arith.cmpi eq, %arg0, %c0_i32 : i32
    %1 = arith.extui %0 : i1 to i32
    %c0_i32_0 = arith.constant 0 : i32
    %2 = arith.cmpi ne, %1, %c0_i32_0 : i32
    scf.if %2 {
      %cst_14 = arith.constant 0.000000e+00 : f32
      %30 = vector.broadcast %cst_14 : f32 to vector<8x128xf32>
      %c0_15 = arith.constant 0 : index
      %c0_16 = arith.constant 0 : index
      %31 = vector.load %arg3[%c0_15, %c0_16] : memref<8x128xf32, #tpu.memory_space<vmem>>, vector<8x128xf32>
      tpu.vector_store %arg3[%c0_15, %c0_16], %30 {strides = array<i32>} : memref<8x128xf32, #tpu.memory_space<vmem>>, vector<8x128xf32>,
    } else {
    }
    %c0 = arith.constant 0 : index
    %c0_1 = arith.constant 0 : index
    %3 = vector.load %arg1[%c0, %c0_1] : memref<16x128xf32, #tpu.memory_space<vmem>>, vector<16x128xf32>
    %c0_2 = arith.constant 0 : index
    %c0_3 = arith.constant 0 : index
    %4 = vector.load %arg2[%c0_2, %c0_3] : memref<16x128xf32, #tpu.memory_space<vmem>>, vector<16x128xf32>
    %cst = arith.constant 2.000000e+00 : f32
    %5 = vector.broadcast %cst : f32 to vector<16x128xf32>
    %6 = arith.mulf %5, %4 : vector<16x128xf32>
    %cst_4 = arith.constant 1.000000e+00 : f32
    %7 = vector.broadcast %cst_4 : f32 to vector<16x128xf32>
    %8 = arith.subf %6, %7 : vector<16x128xf32>
    %9 = arith.mulf %8, %3 : vector<16x128xf32>
    %10 = arith.negf %9 : vector<16x128xf32>
    %11 = math.exp %10 : vector<16x128xf32>
    %cst_5 = arith.constant 1.000000e+00 : f32
    %12 = vector.broadcast %cst_5 : f32 to vector<16x128xf32>
    %13 = arith.addf %12, %11 : vector<16x128xf32>
    %14 = arith.divf %12, %13 : vector<16x128xf32>
    %15 = math.log %14 : vector<16x128xf32>
    %cst_6 = arith.constant -1.000000e+02 : f32
    %16 = vector.broadcast %cst_6 : f32 to vector<16x128xf32>
    %17 = arith.maximumf %15, %16 : vector<16x128xf32>
    %cst_7 = arith.constant 0.000000e+00 : f32
    %18 = vector.broadcast %cst_7 : f32 to vector<16x128xf32>
    %19 = arith.subf %18, %17 : vector<16x128xf32>
    %cst_8 = arith.constant 1.000000e+00 : f32
    %20 = vector.broadcast %cst_8 : f32 to vector<16x128xf32>
    %21 = arith.subf %20, %14 : vector<16x128xf32>
    %22 = arith.mulf %21, %21 : vector<16x128xf32>
    %23 = arith.mulf %19, %22 : vector<16x128xf32>
    %24 = arith.mulf %4, %23 : vector<16x128xf32>
    %25 = vector.shape_cast %24 : vector<16x128xf32> to vector<2x8x128xf32>
    %cst_9 = arith.constant dense<0.000000e+00> : vector<8x128xf32>
    %26 = vector.multi_reduction <add>, %25, %cst_9 [0] : vector<2x8x128xf32> to vector<8x128xf32>
    %c0_10 = arith.constant 0 : index
    %c0_11 = arith.constant 0 : index
    %27 = vector.load %arg3[%c0_10, %c0_11] : memref<8x128xf32, #tpu.memory_space<vmem>>, vector<8x128xf32>
    %28 = arith.addf %27, %26 : vector<8x128xf32>
    %c0_12 = arith.constant 0 : index
    %c0_13 = arith.constant 0 : index
    %29 = vector.load %arg3[%c0_12, %c0_13] : memref<8x128xf32, #tpu.memory_space<vmem>>, vector<8x128xf32>
    tpu.vector_store %arg3[%c0_12, %c0_13], %28 {strides = array<i32>} : memref<8x128xf32, #tpu.memory_space<vmem>>, vector<8x128xf32>,
    return
  }
  func.func @transform_0(%arg0: i32) -> (i32, i32) {
    %c0_i32 = arith.constant 0 : i32
    %c0_i32_0 = arith.constant 0 : i32
    return %arg0, %c0_i32 : i32, i32
  }
  func.func @transform_1(%arg0: i32) -> (i32, i32) {
    %c0_i32 = arith.constant 0 : i32
    %c0_i32_0 = arith.constant 0 : i32
    return %arg0, %c0_i32 : i32, i32
  }
  func.func @transform_2(%arg0: i32) -> (i32, i32) {
    %c0_i32 = arith.constant 0 : i32
    %c0_i32_0 = arith.constant 0 : i32
    %c0_i32_1 = arith.constant 0 : i32
    return %c0_i32, %c0_i32_0 : i32, i32
  }
}

</mosaic_0001>

<bundles_post_ra>
// kernel: _focal_loss_impl.1
= control target key start
LH: loop header
LB: loop body
LE: loop exit
PB: predicated region body
PF: predicated region fallthrough
CT: control target
= control target key end

     0   :  { %7 = vsyncpa [#allocation3], 0  ;;  %s231_s0 = inlined_call_operand.hbm [shape: f32[16,128], index: 0, kind: input, shape index: {}]   ;;  %s232_s1 = inlined_call_operand.hbm [shape: f32[16,128], index: 1, kind: input, shape index: {}]   ;;  %s233_s2 = inlined_call_operand.vmem [shape: f32[8,128], index: 2, kind: output, shape index: {}]  }
   0x1   :  { %s13_s11 = sshll.u32 %s231_s0, 4  ;;  %s14_s11 = int_to_ptr.hbm [resolvable:$true] %s13_s11 }
   0x2   :  { %8 = vsyncpa [#allocation5], 0  ;;  %s195_s12 = smov [#allocation2]   ;;  %s26_s16 = sshll.u32 %s232_s1, 4  ;;  %s27_s16 = int_to_ptr.hbm [resolvable:$true] %s26_s16 }
   0x3   :  { %s15_s13 = sshll.u32 %s195_s12, 4  ;;  %s196_s17 = smov 128   ;;  %s16_s13 = int_to_ptr.vmem [resolvable:$true] %s15_s13 }
   0x4   :  { %s197_s18 = smov 8   ;;  %s198_s19 = smov [#allocation4]  }
   0x5   :  { %21 = dma.hbm_to_vmem [thread:$0]  %s14_s11, 256, %s16_s13, [#allocation3], %s196_s17, %s196_s17, %s197_s18  }
   0x6   :  { %s28_s20 = sshll.u32 %s198_s19, 4  ;;  %s29_s20 = int_to_ptr.vmem [resolvable:$true] %s28_s20 }
   0x7   :  { %34 = dma.hbm_to_vmem [thread:$0]  %s27_s16, 256, %s29_s20, [#allocation5], %s196_s17, %s196_s17, %s197_s18  }
   0x8   :  { %191 = dma.done.wait [#allocation3], 256  }
   0x9   :  { %192 = vsyncadd [#allocation3], 4294967040 }
   0xa   :  { %193 = dma.done.wait [#allocation5], 256  }
   0xb   :  { %194 = vsyncadd [#allocation5], 4294967040  ;;  %v220_v0 = vld [vmem:[#allocation4] sm:$0xff]  ;;  %v222_v1 = vld [vmem:[#allocation4 + $0x8] sm:$0xff] }
   0xc   :  { %v52_v2 = vmul.f32 2.0, %v220_v0  ;;  %v48_v3 = vld [vmem:[#allocation2] sm:$0xff]  ;;  %v53_v4 = vmul.f32 2.0, %v222_v1  ;;  %v49_v5 = vld [vmem:[#allocation2 + $0x8] sm:$0xff] }
   0xe   :  { %v122_v6 = vadd.f32 -1.0, %v52_v2  ;;  %v123_v7 = vadd.f32 -1.0, %v53_v4 }
  0x10   :  { %v56_v8 = vmul.f32 %v122_v6, %v48_v3  ;;  %v57_v9 = vmul.f32 %v123_v7, %v49_v5 }
  0x12   :  { %v124_v10 = vmul.f32 -1.442695, %v56_v8  ;;  %v125_v11 = vmul.f32 -1.442695, %v57_v9 }
  0x14   :  { %131 = vpow2.f32 %v124_v10 }
  0x15   :  { %133 = vpow2.f32 %v125_v11 }
  0x1a   :  { %v132_v12 = vpop.eup %131 }
  0x1b   :  { %v134_v13 = vpop.eup %133  ;;  %v64_v14 = vadd.f32 1.0, %v132_v12 }
  0x1c   :  { %v65_v15 = vadd.f32 1.0, %v134_v13 }
  0x1d   :  { %135 = vrcp.f32 %v64_v14  ;;  %vm71_vm0 = vweird.f32 %v64_v14  ;;  %v77_v19 = vand.u32 2147483648, %v64_v14  ;;  %v75_v22 = vand.u32 2147483647, %v64_v14 }
  0x1e   :  { %137 = vrcp.f32 %v65_v15  ;;  %v92_v23 = vand.u32 2147483648, %v65_v15  ;;  %vm86_vm2 = vweird.f32 %v65_v15  ;;  %v90_v25 = vand.u32 2147483647, %v65_v15 }
  0x1f   :  { %v78_v27 = vor.u32 1.1754944e-38, %v77_v19  ;;  %vm76_vm5 = vcmp.eq.f32.partialorder %v75_v22, 8.507059e+37 }
  0x20   :  { %v93_v30 = vor.u32 1.1754944e-38, %v92_v23  ;;  %vm91_vm7 = vcmp.eq.f32.partialorder %v90_v25, 8.507059e+37 }
  0x23   :  { %v136_v16 = vpop.eup %135 }
  0x24   :  { %v138_v17 = vpop.eup %137  ;;  %v67_v18 = vmul.f32 %v136_v16, %v64_v14  ;;  %vm72_vm1 = vweird.f32 %v136_v16 }
  0x25   :  { %v82_v20 = vmul.f32 %v138_v17, %v65_v15  ;;  %vm87_vm3 = vweird.f32 %v138_v17  ;;  %vm73_vm4 = vmor %vm71_vm0, %vm72_vm1 }
  0x26   :  { %v68_v21 = vsub.f32 1.0, %v67_v18  ;;  %vm88_vm6 = vmor %vm86_vm2, %vm87_vm3 }
  0x27   :  { %v83_v24 = vsub.f32 1.0, %v82_v20 }
  0x28   :  { %v69_v26 = vmul.f32 %v136_v16, %v68_v21 }
  0x29   :  { %v84_v28 = vmul.f32 %v138_v17, %v83_v24 }
  0x2a   :  { %v70_v29 = vadd.f32 %v136_v16, %v69_v26 }
  0x2b   :  { %v85_v31 = vadd.f32 %v138_v17, %v84_v28 }
  0x2c   :  { %v74_v32 = vsel %vm73_vm4, %v136_v16, %v70_v29 }
  0x2d   :  { %v79_v33 = vsel %vm76_vm5, %v78_v27, %v74_v32  ;;  %v89_v34 = vsel %vm88_vm6, %v138_v17, %v85_v31 }
  0x2e   :  { %v94_v35 = vsel %vm91_vm7, %v93_v30, %v89_v34  ;;  %139 = vlog2.f32 %v79_v33  ;;  %v104_v36 = vsub.f32 1.0, %v79_v33 }
  0x2f   :  { %141 = vlog2.f32 %v94_v35  ;;  %v105_v38 = vsub.f32 1.0, %v94_v35 }
  0x30   :  { %v106_v43 = vmul.f32 %v104_v36, %v104_v36 }
  0x31   :  { %v107_v45 = vmul.f32 %v105_v38, %v105_v38 }
  0x34   :  { %v140_v37 = vpop.eup %139 }
  0x35   :  { %v142_v39 = vpop.eup %141  ;;  %v97_v40 = vmul.f32 0.6931472, %v140_v37 }
  0x36   :  { %v99_v41 = vmul.f32 0.6931472, %v142_v39 }
  0x37   :  { %v100_v42 = vmax.f32 %v97_v40, -100.0 }
  0x38   :  { %v101_v44 = vmax.f32 %v99_v41, -100.0 }
  0x39   :  { %v102_v46 = vsub.f32 0.0, %v100_v42 }
  0x3a   :  { %v103_v47 = vsub.f32 0.0, %v101_v44 }
  0x3b   :  { %v108_v48 = vmul.f32 %v106_v43, %v102_v46 }
  0x3c   :  { %v109_v49 = vmul.f32 %v107_v45, %v103_v47 }
  0x3d   :  { %v110_v50 = vmul.f32 %v108_v48, %v220_v0 }
  0x3e   :  { %v111_v51 = vmul.f32 %v109_v49, %v222_v1 }
  0x40   :  { %v112_v52 = vadd.f32 %v111_v51, %v110_v50 }
  0x42   :  { %115 = vst [vmem:[%s233_s2] sm:$0xff] %v112_v52 }
  0x43   :  { %120 = vsyncpa [#allocation3], 1 }
  0x44   :  { %121 = vsyncpa [#allocation5], 1 }

</bundles_post_ra>
